<compile_context>
chip_gen: v5e
topology: v5e:2x2
jax: 0.10.0
libtpu: 0.0.40
codegen_flags: <defaults>
</compile_context>

<pallas_src>
import jax
import jax.numpy as jnp
from jax.experimental import pallas as pl
from jax.experimental.pallas import tpu as pltpu


def _copy_kernel(x_ref, o_ref):
    # Identity copy of one (tile_n, tile_f) block. The flatten itself happened
    # in the wrapper, so this is pure DMA-in / DMA-out with no relayout.
    o_ref[...] = x_ref[...]


def _pick_tile(dim, base, target):
    """Largest multiple of `base` that divides `dim` and is <= `target`.
    Falls back to the full dim (always a legal block size)."""
    if dim % base != 0 or dim <= base:
        return dim
    t = min(target, dim)
    t -= t % base
    while t > base and dim % t != 0:
        t -= base
    return t if (t > 0 and dim % t == 0) else dim


def flatten(x):
    """Equivalent of torch `x.view(x.size(0), -1)` for a contiguous tensor."""
    n = x.shape[0]
    flat = 1
    for d in x.shape[1:]:
        flat *= d

    # Collapse trailing axes OUTSIDE the kernel (row-major, identical ordering
    # to torch .view on an NCHW-contiguous tensor). XLA treats this as layout.
    x2 = jnp.reshape(x, (n, flat))

    itemsize = jnp.dtype(x.dtype).itemsize
    # Min sublane multiple per dtype: f32 -> 8, bf16 -> 16, int8/fp8 -> 32.
    min_sublane = max(8, 32 // max(itemsize, 1))

    # Lane-dense tiles: 128-multiple lanes (aim <= 2048), modest row count so
    # (2 in + 2 out) double-buffers stay well under every generation's VMEM.
    tile_f = _pick_tile(flat, 128, 2048)
    tile_n = _pick_tile(n, min_sublane, 8 * min_sublane)

    grid = (n // tile_n, flat // tile_f)

    cost = pl.CostEstimate(
        flops=0,
        transcendentals=0,
        bytes_accessed=2 * n * flat * itemsize,  # read + write, no compute
    )

    return pl.pallas_call(
        _copy_kernel,
        out_shape=jax.ShapeDtypeStruct((n, flat), x.dtype),
        grid=grid,
        in_specs=[pl.BlockSpec((tile_n, tile_f), lambda i, j: (i, j))],
        out_specs=pl.BlockSpec((tile_n, tile_f), lambda i, j: (i, j)),
        compiler_params=pltpu.CompilerParams(
            dimension_semantics=("parallel", "parallel"),
        ),
        cost_estimate=cost,
    )(x2)


if __name__ == "__main__":
    key = jax.random.PRNGKey(0)
    # Small NCHW input consistent with a conv-backbone feature map.
    x = jax.random.normal(key, (2, 4, 16, 16), dtype=jnp.float32)

    y = jax.block_until_ready(flatten(x))

    # Sanity check against plain JAX reshape (same semantics as torch .view).
    y_ref = x.reshape(x.shape[0], -1)
    assert y.shape == (2, 4 * 16 * 16), y.shape
    assert y.dtype == x.dtype
    assert jnp.array_equal(y, y_ref), "mismatch vs reference reshape"

    print("KERNEL_OK")
</pallas_src>

<mosaic_0001>
module attributes {stable_mosaic.version = 11 : i64} {
  func.func @_copy_kernel(%arg0: i32, %arg1: i32, %arg2: memref<2x1024xf32, #tpu.memory_space<vmem>>, %arg3: memref<2x1024xf32, #tpu.memory_space<vmem>>) attributes {dimension_semantics = [#tpu.dimension_semantics<parallel>, #tpu.dimension_semantics<parallel>], iteration_bounds = array<i64: 1, 1>, scalar_prefetch = 0 : i64, scratch_operands = 0 : i64, tpu.core_type = #tpu.core_type<tc>, window_params = [{transform_indices = @transform_0, window_bounds = array<i64: 2, 1024>}, {transform_indices = @transform_1, window_bounds = array<i64: 2, 1024>}]} {
    %c0 = arith.constant 0 : index
    %c0_0 = arith.constant 0 : index
    %0 = vector.load %arg2[%c0, %c0_0] : memref<2x1024xf32, #tpu.memory_space<vmem>>, vector<2x1024xf32>
    %c0_1 = arith.constant 0 : index
    %c0_2 = arith.constant 0 : index
    %1 = vector.load %arg3[%c0_1, %c0_2] : memref<2x1024xf32, #tpu.memory_space<vmem>>, vector<2x1024xf32>
    tpu.vector_store %arg3[%c0_1, %c0_2], %0 {strides = array<i32>} : memref<2x1024xf32, #tpu.memory_space<vmem>>, vector<2x1024xf32>,
    return
  }
  func.func @transform_0(%arg0: i32, %arg1: i32) -> (i32, i32) {
    %c0_i32 = arith.constant 0 : i32
    return %arg0, %arg1 : i32, i32
  }
  func.func @transform_1(%arg0: i32, %arg1: i32) -> (i32, i32) {
    %c0_i32 = arith.constant 0 : i32
    return %arg0, %arg1 : i32, i32
  }
}

</mosaic_0001>

<bundles_post_ra>
// kernel: tpu_custom_call.1
= control target key start
LH: loop header
LB: loop body
LE: loop exit
PB: predicated region body
PF: predicated region fallthrough
CT: control target
= control target key end

     0   :  { %6 = vsyncpa [#allocation3], 0  ;;  %s116_s0 = inlined_call_operand.hbm [shape: f32[2,1024], index: 0, kind: input, shape index: {}]   ;;  %s117_s1 = inlined_call_operand.hbm [shape: f32[2,1024], index: 1, kind: output, shape index: {}]  }
   0x1   :  { %7 = vsyncpa [#allocation4], 0  ;;  %s13_s8 = sshll.u32 %s116_s0, 4  ;;  %s98_s9 = smov [#allocation2]   ;;  %s14_s8 = int_to_ptr.hbm [resolvable:$true] %s13_s8 }
   0x2   :  { %s15_s10 = sshll.u32 %s98_s9, 4  ;;  %s16_s10 = int_to_ptr.vmem [resolvable:$true] %s15_s10 }
   0x3   :  { %18 = dma.hbm_to_vmem [thread:$0]  %s14_s8, 256, %s16_s10, [#allocation3]  }
   0x4   :  { %94 = dma.done.wait [#allocation3], 256  }
   0x5   :  { %95 = vsyncadd [#allocation3], 4294967040  ;;  %s99_s11 = smov [#allocation5]   ;;  %s34_s15 = sshll.u32 %s117_s1, 4  ;;  %v23_v0 = vld [vmem:[#allocation2] sm:$0xff]  ;;  %v24_v1 = vld [vmem:[#allocation2 + $0x8] sm:$0xff]  ;;  %s35_s15 = int_to_ptr.hbm [resolvable:$true] %s34_s15 }
   0x6   :  { %s32_s12 = sshll.u32 %s99_s11, 4  ;;  %25 = vst [vmem:[#allocation5] sm:$0xff] %v23_v0  ;;  %s33_s12 = int_to_ptr.vmem [resolvable:$true] %s32_s12 }
   0x7   :  { %26 = vst [vmem:[#allocation5 + $0x8] sm:$0xff] %v24_v1 }
   0x8   :  { %37 = dma.vmem_to_hbm [thread:$0]  %s33_s12, 256, %s35_s15, [#allocation4]  }
   0x9   :  { %96 = dma.done.wait [#allocation4], 256  }
   0xa   :  { %97 = vsyncadd [#allocation4], 4294967040 }
   0xb   :  { %42 = vsyncpa [#allocation3], 1 }
   0xc   :  { %43 = vsyncpa [#allocation4], 1 }

</bundles_post_ra>
